<compile_context>
chip_gen: v7x
topology: tpu7x:2x2x1
jax: 0.10.0
libtpu: 0.0.40
codegen_flags: <defaults>
</compile_context>

<pallas_src>
import jax
import jax.numpy as jnp
from jax.experimental import pallas as pl
from jax.experimental.pallas import tpu as pltpu

LANE = 128  # TPU lane width; hidden/output feature dims are zero-padded to this


def _round_up(n: int, m: int) -> int:
    return ((n + m - 1) // m) * m


def actor_mlp_kernel(x_ref, w_ref, b_ref, o_ref, xpad_ref):
    """Fused 3-layer MLP on one (tm, in_dim) batch tile.

    x_ref    : (tm, in_dim)     unpadded f32 activation tile
    w_ref    : (3, LANE, LANE)  pre-transposed, zero-padded bf16 weights (VMEM-resident)
    b_ref    : (3, LANE)        zero-padded f32 biases (VMEM-resident)
    o_ref    : (tm, LANE)       lane-dense bf16 output tile; real logits in cols [:out_dim]
    xpad_ref : (tm, LANE)       VMEM scratch used to widen x to a lane-dense MXU operand
    """
    tm, in_dim = x_ref.shape
    lane = xpad_ref.shape[1]
    cdt = w_ref.dtype

    # Widen the 16-lane input tile to a lane-dense 128-lane operand.  Pad lanes are
    # zeroed explicitly every step (scratch is uninitialized and may hold NaN bit
    # patterns; zeroing keeps this correct under any grid/core partitioning).
    xpad_ref[:, :in_dim] = x_ref[...].astype(cdt)
    xpad_ref[:, in_dim:] = jnp.zeros((tm, lane - in_dim), cdt)
    x = xpad_ref[...]

    w1 = w_ref[0]
    w2 = w_ref[1]
    w3 = w_ref[2]
    b1 = b_ref[0:1, :]
    b2 = b_ref[1:2, :]
    b3 = b_ref[2:3, :]

    # Layer 1: Linear + ReLU (MXU matmul, f32 accumulate; cast back for next MXU pass)
    h1 = jnp.dot(x, w1, preferred_element_type=jnp.float32) + b1
    h1 = jnp.maximum(h1, 0.0).astype(cdt)

    # Layer 2: Linear + ReLU
    h2 = jnp.dot(h1, w2, preferred_element_type=jnp.float32) + b2
    h2 = jnp.maximum(h2, 0.0).astype(cdt)

    # Layer 3: Linear (raw logits, no activation); bf16 writeback halves output HBM traffic.
    out = jnp.dot(h2, w3, preferred_element_type=jnp.float32) + b3
    o_ref[...] = out.astype(o_ref.dtype)


def actor_net_forward(x, w_stack, b_stack, out_dim, *, block_rows=2048):
    """ActorNet forward.  x: (B, in_dim) f32 -> (B, out_dim) f32 logits."""
    B, in_dim = x.shape
    pad = w_stack.shape[-1]
    compute_dtype = w_stack.dtype
    assert block_rows % 16 == 0  # bf16 sublane packing: keep row tiles 16-aligned

    tm = min(block_rows, _round_up(B, 16))
    n_blocks = pl.cdiv(B, tm)  # last block may be partial: OOB reads are junk rows
    #                            (row-local compute), OOB writes are masked.

    cost = pl.CostEstimate(
        flops=2 * n_blocks * tm * 3 * pad * pad,
        transcendentals=0,
        bytes_accessed=x.size * x.dtype.itemsize
        + w_stack.size * w_stack.dtype.itemsize
        + b_stack.size * b_stack.dtype.itemsize
        + B * pad * compute_dtype.itemsize,
    )

    def _call(dim_semantics):
        return pl.pallas_call(
            actor_mlp_kernel,
            out_shape=jax.ShapeDtypeStruct((B, pad), compute_dtype),
            grid=(n_blocks,),
            in_specs=[
                pl.BlockSpec((tm, in_dim), lambda i: (i, 0)),      # unpadded batch-tiled x
                pl.BlockSpec(w_stack.shape, lambda i: (0, 0, 0)),  # weights VMEM-resident
                pl.BlockSpec(b_stack.shape, lambda i: (0, 0)),     # f32 biases VMEM-resident
            ],
            out_specs=pl.BlockSpec((tm, pad), lambda i: (i, 0)),   # lane-dense bf16 output
            scratch_shapes=[pltpu.VMEM((tm, pad), compute_dtype)],
            compiler_params=pltpu.CompilerParams(
                dimension_semantics=dim_semantics,
                vmem_limit_bytes=32 * 1024 * 1024,  # budget against v7x (64 MiB physical)
            ),
            cost_estimate=cost,
        )(x, w_stack, b_stack)

    # CORE_PARALLEL is the only semantic that actually engages v7x's second
    # TensorCore; fall back to plain "parallel" on chips/grids where the
    # core-parallel partitioning is rejected (e.g. single-TC, odd grids).
    primary = (pltpu.CORE_PARALLEL,) if n_blocks > 1 else ("parallel",)
    try:
        out_p = _call(primary)
    except Exception:
        out_p = _call(("parallel",))

    # Slice back to the true (B, out_dim) logits and cast to f32 (touches B*out_dim only).
    return out_p[:B, :out_dim].astype(jnp.float32)


def init_actor_net_params(key, in_dim, out_dim, hid=64, *, pad=LANE, dtype=jnp.bfloat16):
    """Deterministic init mirroring ActorNet.__init__:
       - hidden layers: PyTorch default uniform(+/- 1/sqrt(fan_in))
       - last layer: weight uniform(-0.003, 0.003), bias zeros.
    Returns (w_stack, b_stack, raw): weights pre-transposed to (F_in, F_out),
    zero-padded to (pad, pad), stacked and cast to bf16; biases zero-padded to (pad,)
    and kept in f32; plus raw unpadded f32 params for reference checking."""
    assert max(in_dim, hid, out_dim) <= pad
    k1, k2, k3, k4, k5 = jax.random.split(key, 5)

    bound1 = 1.0 / float(in_dim) ** 0.5
    w1 = jax.random.uniform(k1, (in_dim, hid), jnp.float32, -bound1, bound1)
    b1 = jax.random.uniform(k2, (hid,), jnp.float32, -bound1, bound1)

    bound2 = 1.0 / float(hid) ** 0.5
    w2 = jax.random.uniform(k3, (hid, hid), jnp.float32, -bound2, bound2)
    b2 = jax.random.uniform(k4, (hid,), jnp.float32, -bound2, bound2)

    w3 = jax.random.uniform(k5, (hid, out_dim), jnp.float32, -0.003, 0.003)
    b3 = jnp.zeros((out_dim,), jnp.float32)

    def pad_w(w):
        return jnp.zeros((pad, pad), jnp.float32).at[: w.shape[0], : w.shape[1]].set(w)

    def pad_b(b):
        return jnp.zeros((pad,), jnp.float32).at[: b.shape[0]].set(b)

    w_stack = jnp.stack([pad_w(w1), pad_w(w2), pad_w(w3)]).astype(dtype)
    b_stack = jnp.stack([pad_b(b1), pad_b(b2), pad_b(b3)])  # keep biases in f32
    raw = (w1, b1, w2, b2, w3, b3)
    return w_stack, b_stack, raw


def reference_forward(x, raw, compute_dtype=jnp.bfloat16):
    """Plain-JAX reference: bf16 weights/activations, f32 accumulation, f32 biases."""
    w1, b1, w2, b2, w3, b3 = raw
    w1, w2, w3 = (w.astype(compute_dtype) for w in (w1, w2, w3))
    h = x.astype(compute_dtype)
    h = jnp.dot(h, w1, preferred_element_type=jnp.float32) + b1
    h = jnp.maximum(h, 0.0).astype(compute_dtype)
    h = jnp.dot(h, w2, preferred_element_type=jnp.float32) + b2
    h = jnp.maximum(h, 0.0).astype(compute_dtype)
    return jnp.dot(h, w3, preferred_element_type=jnp.float32) + b3


if __name__ == "__main__":
    # Small shapes consistent with a PPO actor head.
    B, in_dim, hid, out_dim = 8, 16, 64, 6

    key = jax.random.PRNGKey(0)
    kx, kx2, kp = jax.random.split(key, 3)
    x = jax.random.normal(kx, (B, in_dim), dtype=jnp.float32)

    w_stack, b_stack, raw = init_actor_net_params(kp, in_dim, out_dim, hid)

    # Single-block path.
    out = jax.block_until_ready(actor_net_forward(x, w_stack, b_stack, out_dim))
    ref = reference_forward(x, raw)
    assert out.shape == (B, out_dim)
    assert jnp.allclose(out, ref, atol=2e-3, rtol=5e-2), float(jnp.abs(out - ref).max())

    # Multi-block grid path: several grid steps, partial last block, weights stay
    # VMEM-resident across iterations.
    B2 = 300
    x2 = jax.random.normal(kx2, (B2, in_dim), dtype=jnp.float32)
    out2 = jax.block_until_ready(
        actor_net_forward(x2, w_stack, b_stack, out_dim, block_rows=128)
    )
    ref2 = reference_forward(x2, raw)
    assert out2.shape == (B2, out_dim)
    assert jnp.allclose(out2, ref2, atol=2e-3, rtol=5e-2), float(jnp.abs(out2 - ref2).max())

    print("KERNEL_OK")
</pallas_src>

<mosaic_0001>
module attributes {stable_mosaic.version = 11 : i64} {
  func.func @actor_mlp_kernel(%arg0: i32, %arg1: memref<16x16xf32, #tpu.memory_space<vmem>>, %arg2: memref<3x128x128xbf16, #tpu.memory_space<vmem>>, %arg3: memref<3x128xf32, #tpu.memory_space<vmem>>, %arg4: memref<16x128xbf16, #tpu.memory_space<vmem>>, %arg5: memref<16x128xbf16, #tpu.memory_space<vmem>>) attributes {dimension_semantics = [#tpu.dimension_semantics<parallel>], iteration_bounds = array<i64: 1>, scalar_prefetch = 0 : i64, scratch_operands = 1 : i64, tpu.core_type = #tpu.core_type<tc>, window_params = [{transform_indices = @transform_0, window_bounds = array<i64: 16, 16>}, {pipeline_mode = #tpu.pipeline_mode<synchronous>, transform_indices = @transform_1, window_bounds = array<i64: 3, 128, 128>}, {pipeline_mode = #tpu.pipeline_mode<synchronous>, transform_indices = @transform_2, window_bounds = array<i64: 3, 128>}, {transform_indices = @transform_3, window_bounds = array<i64: 16, 128>}]} {
    %c0 = arith.constant 0 : index
    %c0_0 = arith.constant 0 : index
    %0 = vector.load %arg1[%c0, %c0_0] : memref<16x16xf32, #tpu.memory_space<vmem>>, vector<16x16xf32>
    %1 = arith.truncf %0 : vector<16x16xf32> to vector<16x16xbf16>
    %c0_1 = arith.constant 0 : index
    %c0_2 = arith.constant 0 : index
    %2 = vector.load %arg5[%c0_1, %c0_2] : memref<16x128xbf16, #tpu.memory_space<vmem>>, vector<16x16xbf16>
    tpu.vector_store %arg5[%c0_1, %c0_2], %1 {strides = array<i32>} : memref<16x128xbf16, #tpu.memory_space<vmem>>, vector<16x16xbf16>,
    %cst = arith.constant 0.000000e+00 : bf16
    %3 = vector.broadcast %cst : bf16 to vector<16x112xbf16>
    %c0_3 = arith.constant 0 : index
    %c16 = arith.constant 16 : index
    %4 = vector.load %arg5[%c0_3, %c16] : memref<16x128xbf16, #tpu.memory_space<vmem>>, vector<16x112xbf16>
    tpu.vector_store %arg5[%c0_3, %c16], %3 {strides = array<i32>} : memref<16x128xbf16, #tpu.memory_space<vmem>>, vector<16x112xbf16>,
    %c0_4 = arith.constant 0 : index
    %c0_5 = arith.constant 0 : index
    %5 = vector.load %arg5[%c0_4, %c0_5] : memref<16x128xbf16, #tpu.memory_space<vmem>>, vector<16x128xbf16>
    %c0_6 = arith.constant 0 : index
    %c0_7 = arith.constant 0 : index
    %c0_8 = arith.constant 0 : index
    %6 = vector.load %arg2[%c0_6, %c0_7, %c0_8] : memref<3x128x128xbf16, #tpu.memory_space<vmem>>, vector<1x128x128xbf16>
    %7 = vector.shape_cast %6 : vector<1x128x128xbf16> to vector<128x128xbf16>
    %c1 = arith.constant 1 : index
    %c0_9 = arith.constant 0 : index
    %c0_10 = arith.constant 0 : index
    %8 = vector.load %arg2[%c1, %c0_9, %c0_10] : memref<3x128x128xbf16, #tpu.memory_space<vmem>>, vector<1x128x128xbf16>
    %9 = vector.shape_cast %8 : vector<1x128x128xbf16> to vector<128x128xbf16>
    %c2 = arith.constant 2 : index
    %c0_11 = arith.constant 0 : index
    %c0_12 = arith.constant 0 : index
    %10 = vector.load %arg2[%c2, %c0_11, %c0_12] : memref<3x128x128xbf16, #tpu.memory_space<vmem>>, vector<1x128x128xbf16>
    %11 = vector.shape_cast %10 : vector<1x128x128xbf16> to vector<128x128xbf16>
    %c0_13 = arith.constant 0 : index
    %c0_14 = arith.constant 0 : index
    %12 = vector.load %arg3[%c0_13, %c0_14] : memref<3x128xf32, #tpu.memory_space<vmem>>, vector<1x128xf32>
    %c1_15 = arith.constant 1 : index
    %c0_16 = arith.constant 0 : index
    %13 = vector.load %arg3[%c1_15, %c0_16] : memref<3x128xf32, #tpu.memory_space<vmem>>, vector<1x128xf32>
    %c2_17 = arith.constant 2 : index
    %c0_18 = arith.constant 0 : index
    %14 = vector.load %arg3[%c2_17, %c0_18] : memref<3x128xf32, #tpu.memory_space<vmem>>, vector<1x128xf32>
    %cst_19 = arith.constant dense<0.000000e+00> : vector<16x128xf32>
    %15 = tpu.matmul %5, %7, %cst_19 {dimension_numbers = #tpu.dot_dimension_numbers<[1], [0], [0], [1], [0, 0, 1, 1], [], []>} : vector<16x128xbf16>, vector<128x128xbf16>, vector<16x128xf32> -> vector<16x128xf32>
    %16 = vector.broadcast %12 : vector<1x128xf32> to vector<16x128xf32>
    %17 = arith.addf %15, %16 : vector<16x128xf32>
    %cst_20 = arith.constant 0.000000e+00 : f32
    %18 = vector.broadcast %cst_20 : f32 to vector<16x128xf32>
    %19 = arith.maximumf %17, %18 : vector<16x128xf32>
    %20 = arith.truncf %19 : vector<16x128xf32> to vector<16x128xbf16>
    %cst_21 = arith.constant dense<0.000000e+00> : vector<16x128xf32>
    %21 = tpu.matmul %20, %9, %cst_21 {dimension_numbers = #tpu.dot_dimension_numbers<[1], [0], [0], [1], [0, 0, 1, 1], [], []>} : vector<16x128xbf16>, vector<128x128xbf16>, vector<16x128xf32> -> vector<16x128xf32>
    %22 = vector.broadcast %13 : vector<1x128xf32> to vector<16x128xf32>
    %23 = arith.addf %21, %22 : vector<16x128xf32>
    %cst_22 = arith.constant 0.000000e+00 : f32
    %24 = vector.broadcast %cst_22 : f32 to vector<16x128xf32>
    %25 = arith.maximumf %23, %24 : vector<16x128xf32>
    %26 = arith.truncf %25 : vector<16x128xf32> to vector<16x128xbf16>
    %cst_23 = arith.constant dense<0.000000e+00> : vector<16x128xf32>
    %27 = tpu.matmul %26, %11, %cst_23 {dimension_numbers = #tpu.dot_dimension_numbers<[1], [0], [0], [1], [0, 0, 1, 1], [], []>} : vector<16x128xbf16>, vector<128x128xbf16>, vector<16x128xf32> -> vector<16x128xf32>
    %28 = vector.broadcast %14 : vector<1x128xf32> to vector<16x128xf32>
    %29 = arith.addf %27, %28 : vector<16x128xf32>
    %30 = arith.truncf %29 : vector<16x128xf32> to vector<16x128xbf16>
    %c0_24 = arith.constant 0 : index
    %c0_25 = arith.constant 0 : index
    %31 = vector.load %arg4[%c0_24, %c0_25] : memref<16x128xbf16, #tpu.memory_space<vmem>>, vector<16x128xbf16>
    tpu.vector_store %arg4[%c0_24, %c0_25], %30 {strides = array<i32>} : memref<16x128xbf16, #tpu.memory_space<vmem>>, vector<16x128xbf16>,
    return
  }
  func.func @transform_0(%arg0: i32) -> (i32, i32) {
    %c0_i32 = arith.constant 0 : i32
    %c0_i32_0 = arith.constant 0 : i32
    return %arg0, %c0_i32 : i32, i32
  }
  func.func @transform_1(%arg0: i32) -> (i32, i32, i32) {
    %c0_i32 = arith.constant 0 : i32
    %c0_i32_0 = arith.constant 0 : i32
    %c0_i32_1 = arith.constant 0 : i32
    %c0_i32_2 = arith.constant 0 : i32
    return %c0_i32, %c0_i32_0, %c0_i32_1 : i32, i32, i32
  }
  func.func @transform_2(%arg0: i32) -> (i32, i32) {
    %c0_i32 = arith.constant 0 : i32
    %c0_i32_0 = arith.constant 0 : i32
    %c0_i32_1 = arith.constant 0 : i32
    return %c0_i32, %c0_i32_0 : i32, i32
  }
  func.func @transform_3(%arg0: i32) -> (i32, i32) {
    %c0_i32 = arith.constant 0 : i32
    %c0_i32_0 = arith.constant 0 : i32
    return %arg0, %c0_i32 : i32, i32
  }
}

module attributes {stable_mosaic.version = 11 : i64} {
  func.func @actor_mlp_kernel(%arg0: i32, %arg1: memref<16x16xf32, #tpu.memory_space<vmem>>, %arg2: memref<3x128x128xbf16, #tpu.memory_space<vmem>>, %arg3: memref<3x128xf32, #tpu.memory_space<vmem>>, %arg4: memref<16x128xbf16, #tpu.memory_space<vmem>>, %arg5: memref<16x128xbf16, #tpu.memory_space<vmem>>) attributes {dimension_semantics = [#tpu.dimension_semantics<parallel>], iteration_bounds = array<i64: 1>, scalar_prefetch = 0 : i64, scratch_operands = 1 : i64, tpu.core_type = #tpu.core_type<tc>, window_params = [{transform_indices = @transform_0, window_bounds = array<i64: 16, 16>}, {pipeline_mode = #tpu.pipeline_mode<synchronous>, transform_indices = @transform_1, window_bounds = array<i64: 3, 128, 128>}, {pipeline_mode = #tpu.pipeline_mode<synchronous>, transform_indices = @transform_2, window_bounds = array<i64: 3, 128>}, {transform_indices = @transform_3, window_bounds = array<i64: 16, 128>}]} {
    %c0 = arith.constant 0 : index
    %c0_0 = arith.constant 0 : index
    %0 = vector.load %arg1[%c0, %c0_0] : memref<16x16xf32, #tpu.memory_space<vmem>>, vector<16x16xf32>
    %1 = arith.truncf %0 : vector<16x16xf32> to vector<16x16xbf16>
    %c0_1 = arith.constant 0 : index
    %c0_2 = arith.constant 0 : index
    %2 = vector.load %arg5[%c0_1, %c0_2] : memref<16x128xbf16, #tpu.memory_space<vmem>>, vector<16x16xbf16>
    tpu.vector_store %arg5[%c0_1, %c0_2], %1 {strides = array<i32>} : memref<16x128xbf16, #tpu.memory_space<vmem>>, vector<16x16xbf16>,
    %cst = arith.constant 0.000000e+00 : bf16
    %3 = vector.broadcast %cst : bf16 to vector<16x112xbf16>
    %c0_3 = arith.constant 0 : index
    %c16 = arith.constant 16 : index
    %4 = vector.load %arg5[%c0_3, %c16] : memref<16x128xbf16, #tpu.memory_space<vmem>>, vector<16x112xbf16>
    tpu.vector_store %arg5[%c0_3, %c16], %3 {strides = array<i32>} : memref<16x128xbf16, #tpu.memory_space<vmem>>, vector<16x112xbf16>,
    %c0_4 = arith.constant 0 : index
    %c0_5 = arith.constant 0 : index
    %5 = vector.load %arg5[%c0_4, %c0_5] : memref<16x128xbf16, #tpu.memory_space<vmem>>, vector<16x128xbf16>
    %c0_6 = arith.constant 0 : index
    %c0_7 = arith.constant 0 : index
    %c0_8 = arith.constant 0 : index
    %6 = vector.load %arg2[%c0_6, %c0_7, %c0_8] : memref<3x128x128xbf16, #tpu.memory_space<vmem>>, vector<1x128x128xbf16>
    %7 = vector.shape_cast %6 : vector<1x128x128xbf16> to vector<128x128xbf16>
    %c1 = arith.constant 1 : index
    %c0_9 = arith.constant 0 : index
    %c0_10 = arith.constant 0 : index
    %8 = vector.load %arg2[%c1, %c0_9, %c0_10] : memref<3x128x128xbf16, #tpu.memory_space<vmem>>, vector<1x128x128xbf16>
    %9 = vector.shape_cast %8 : vector<1x128x128xbf16> to vector<128x128xbf16>
    %c2 = arith.constant 2 : index
    %c0_11 = arith.constant 0 : index
    %c0_12 = arith.constant 0 : index
    %10 = vector.load %arg2[%c2, %c0_11, %c0_12] : memref<3x128x128xbf16, #tpu.memory_space<vmem>>, vector<1x128x128xbf16>
    %11 = vector.shape_cast %10 : vector<1x128x128xbf16> to vector<128x128xbf16>
    %c0_13 = arith.constant 0 : index
    %c0_14 = arith.constant 0 : index
    %12 = vector.load %arg3[%c0_13, %c0_14] : memref<3x128xf32, #tpu.memory_space<vmem>>, vector<1x128xf32>
    %c1_15 = arith.constant 1 : index
    %c0_16 = arith.constant 0 : index
    %13 = vector.load %arg3[%c1_15, %c0_16] : memref<3x128xf32, #tpu.memory_space<vmem>>, vector<1x128xf32>
    %c2_17 = arith.constant 2 : index
    %c0_18 = arith.constant 0 : index
    %14 = vector.load %arg3[%c2_17, %c0_18] : memref<3x128xf32, #tpu.memory_space<vmem>>, vector<1x128xf32>
    %cst_19 = arith.constant dense<0.000000e+00> : vector<16x128xf32>
    %15 = tpu.matmul %5, %7, %cst_19 {dimension_numbers = #tpu.dot_dimension_numbers<[1], [0], [0], [1], [0, 0, 1, 1], [], []>} : vector<16x128xbf16>, vector<128x128xbf16>, vector<16x128xf32> -> vector<16x128xf32>
    %16 = vector.broadcast %12 : vector<1x128xf32> to vector<16x128xf32>
    %17 = arith.addf %15, %16 : vector<16x128xf32>
    %cst_20 = arith.constant 0.000000e+00 : f32
    %18 = vector.broadcast %cst_20 : f32 to vector<16x128xf32>
    %19 = arith.maximumf %17, %18 : vector<16x128xf32>
    %20 = arith.truncf %19 : vector<16x128xf32> to vector<16x128xbf16>
    %cst_21 = arith.constant dense<0.000000e+00> : vector<16x128xf32>
    %21 = tpu.matmul %20, %9, %cst_21 {dimension_numbers = #tpu.dot_dimension_numbers<[1], [0], [0], [1], [0, 0, 1, 1], [], []>} : vector<16x128xbf16>, vector<128x128xbf16>, vector<16x128xf32> -> vector<16x128xf32>
    %22 = vector.broadcast %13 : vector<1x128xf32> to vector<16x128xf32>
    %23 = arith.addf %21, %22 : vector<16x128xf32>
    %cst_22 = arith.constant 0.000000e+00 : f32
    %24 = vector.broadcast %cst_22 : f32 to vector<16x128xf32>
    %25 = arith.maximumf %23, %24 : vector<16x128xf32>
    %26 = arith.truncf %25 : vector<16x128xf32> to vector<16x128xbf16>
    %cst_23 = arith.constant dense<0.000000e+00> : vector<16x128xf32>
    %27 = tpu.matmul %26, %11, %cst_23 {dimension_numbers = #tpu.dot_dimension_numbers<[1], [0], [0], [1], [0, 0, 1, 1], [], []>} : vector<16x128xbf16>, vector<128x128xbf16>, vector<16x128xf32> -> vector<16x128xf32>
    %28 = vector.broadcast %14 : vector<1x128xf32> to vector<16x128xf32>
    %29 = arith.addf %27, %28 : vector<16x128xf32>
    %30 = arith.truncf %29 : vector<16x128xf32> to vector<16x128xbf16>
    %c0_24 = arith.constant 0 : index
    %c0_25 = arith.constant 0 : index
    %31 = vector.load %arg4[%c0_24, %c0_25] : memref<16x128xbf16, #tpu.memory_space<vmem>>, vector<16x128xbf16>
    tpu.vector_store %arg4[%c0_24, %c0_25], %30 {strides = array<i32>} : memref<16x128xbf16, #tpu.memory_space<vmem>>, vector<16x128xbf16>,
    return
  }
  func.func @transform_0(%arg0: i32) -> (i32, i32) {
    %c0_i32 = arith.constant 0 : i32
    %c0_i32_0 = arith.constant 0 : i32
    return %arg0, %c0_i32 : i32, i32
  }
  func.func @transform_1(%arg0: i32) -> (i32, i32, i32) {
    %c0_i32 = arith.constant 0 : i32
    %c0_i32_0 = arith.constant 0 : i32
    %c0_i32_1 = arith.constant 0 : i32
    %c0_i32_2 = arith.constant 0 : i32
    return %c0_i32, %c0_i32_0, %c0_i32_1 : i32, i32, i32
  }
  func.func @transform_2(%arg0: i32) -> (i32, i32) {
    %c0_i32 = arith.constant 0 : i32
    %c0_i32_0 = arith.constant 0 : i32
    %c0_i32_1 = arith.constant 0 : i32
    return %c0_i32, %c0_i32_0 : i32, i32
  }
  func.func @transform_3(%arg0: i32) -> (i32, i32) {
    %c0_i32 = arith.constant 0 : i32
    %c0_i32_0 = arith.constant 0 : i32
    return %arg0, %c0_i32 : i32, i32
  }
}

</mosaic_0001>

<bundles_post_ra>
// kernel: tpu_custom_call.1
= control target key start
LH: loop header
LB: loop body
LE: loop exit
PB: predicated region body
PF: predicated region fallthrough
CT: control target
= control target key end

     0   :  { %8 = vsyncpa [#allocation4], 0  ;;  %s758_s0 = inlined_call_operand.hbm [shape: f32[8,16], index: 0, kind: input, shape index: {}]   ;;  %s759_s1 = inlined_call_operand.hbm [shape: bf16[3,128,128], index: 1, kind: input, shape index: {}]   ;;  %s760_s2 = inlined_call_operand.vmem [shape: f32[3,128], index: 2, kind: input, shape index: {}]   ;;  %s761_s3 = inlined_call_operand.hbm [shape: bf16[8,128], index: 3, kind: output, shape index: {}]  }
   0x1   :  { %9 = vsyncpa [#allocation7], 0 }
   0x2   :  { %10 = vsyncpa [#allocation5], 0 }
   0x3   :  { %15 = vsyncadd [#allocation4], 128  ;;  %s647_s12 = smov [#allocation3]   ;;  %s575_s16 = scalar_lea.hbm %s758_s0, 128 }
   0x4   :  { %s16_s13 = sshll.u32 %s647_s12, 4  ;;  %p576_p0 = scmp.ne.s32.totalorder %s758_s0, %s575_s16  ;;  %s17_s13 = int_to_ptr.vmem [resolvable:$true] %s16_s13 }
   0x5   :  { %p579_p1 = scmp.lt.u32.totalorder %s575_s16, %s758_s0 }
   0x7   :  { %p581_p2 = pnand %p579_p1, %p576_p0 }
   0x9   :  { %584 = shalt.err (!%p581_p2)
}
   0xa   :  { %s585_s21 = scalar_lea.vmem %s17_s13, 128  ;;  %s589_s22 = scalar_lea.vmem %s17_s13, 256 }
   0xb   :  { %p586_p3 = scmp.ne.s32.totalorder %s17_s13, %s585_s21  ;;  %p590_p4 = scmp.lt.s32.totalorder %s17_s13, %s17_s13 }
   0xc   :  { %p591_p5 = scmp.lt.s32.totalorder %s589_s22, %s585_s21 }
   0xe   :  { %p592_p6 = por %p591_p5, %p590_p4 }
  0x10   :  { %p593_p7 = pnand %p592_p6, %p586_p3 }
  0x12   :  { %596 = shalt.err (!%p593_p7)
}
  0x13   :  { %s648_s23 = smov 128   ;;  %s649_s24 = smov 8  }
  0x14   :  { %22 = dma.hbm_to_vmem [thread:$0]  %s758_s0, 128, %s17_s13, [#allocation4], %s648_s23, %s648_s23, %s649_s24  }
  0x15   :  { %s650_s27 = smov [#allocation6]   ;;  %s597_s4 = scalar_lea.hbm %s759_s1, 3072 }
  0x16   :  { %s28_s28 = sshll.u32 %s650_s27, 4  ;;  %p598_p8 = scmp.ne.s32.totalorder %s759_s1, %s597_s4  ;;  %s29_s28 = int_to_ptr.vmem [resolvable:$true] %s28_s28 }
  0x17   :  { %p601_p9 = scmp.lt.u32.totalorder %s597_s4, %s759_s1 }
  0x19   :  { %p603_p10 = pnand %p601_p9, %p598_p8 }
  0x1b   :  { %606 = shalt.err (!%p603_p10)
}
  0x1c   :  { %s607_s9 = scalar_lea.vmem %s29_s28, 3072  ;;  %p612_p12 = scmp.lt.s32.totalorder %s29_s28, %s29_s28 }
  0x1d   :  { %p608_p11 = scmp.ne.s32.totalorder %s29_s28, %s607_s9  ;;  %p613_p13 = scmp.lt.s32.totalorder %s607_s9, %s607_s9 }
  0x1f   :  { %p614_p0 = por %p613_p13, %p612_p12 }
  0x21   :  { %p615_p1 = pnand %p614_p0, %p608_p11 }
  0x23   :  { %618 = shalt.err (!%p615_p1)
}
  0x24   :  { %s651_s0 = smov 64   ;;  %s652_s10 = smov 4  }
  0x25   :  { %34 = dma.hbm_to_vmem [thread:$0]  %s759_s1, 3072, %s29_s28, [#allocation7], %s651_s0, %s651_s0, %s652_s10  }
  0x26   :  { %641 = dma.done.wait [#allocation4], 256  }
  0x27   :  { %642 = vsyncadd [#allocation4], 4294967040 }
  0x28   :  { %643 = dma.done.wait [#allocation7], 3072  }
  0x29   :  { %644 = vsyncadd [#allocation7], 4294964224  ;;  %v653_v0 = vmov 0.0   ;;  %vm654_vm0 = vmmov 0   ;;  %v551_v1 = vld [vmem:[#allocation6] sm:$0xff]   ;;  %v552_v2 = vld [vmem:[#allocation6 + $0x8] sm:$0xff]  }
  0x2a   :  { %481 = vmatprep.subr.bf16.mxu0 %v653_v0  ;;  %497 = vmatprep.mubr.msk.bf16.mxu0 %vm654_vm0, %v653_v0  ;;  %v553_v3 = vld [vmem:[#allocation6 + $0x10] sm:$0xff]   ;;  %v45_v5 = vld [vmem:[#allocation3 + $0x8] sm:$0xff]  ;;  %vm47_vm1 = vcmask 130048   ;;  %vm49_vm2 = vcmask 1047680   ;;  %v559_v7 = vld [vmem:[#allocation6 + $0x40] sm:$0xff]   ;;  %v655_v10 = vmov 0  }
  0x2b   :  { %501 = vmatprep.subr.bf16.mxu1 %v653_v0  ;;  %517 = vmatprep.mubr.msk.bf16.mxu1 %vm654_vm0, %v653_v0  ;;  %v44_v4 = vld [vmem:[#allocation3] sm:$0xff]  ;;  %v554_v8 = vld [vmem:[#allocation6 + $0x18] sm:$0xff]   ;;  %v560_v9 = vld [vmem:[#allocation6 + $0x48] sm:$0xff]  }
  0x2c   :  { %482 = vmatpush3.bf16.msra.mxu0 %v551_v1  ;;  %v46_v6 = vpack.c.bf16 %v45_v5, %v44_v4  ;;  %502 = vmatpush3.bf16.msra.mxu1 %v559_v7  ;;  %v555_v11 = vld [vmem:[#allocation6 + $0x20] sm:$0xff]   ;;  %v561_v12 = vld [vmem:[#allocation6 + $0x50] sm:$0xff]   ;;  %v556_v13 = vld [vmem:[#allocation6 + $0x28] sm:$0xff]  }
  0x2d   :  { %483 = vmatprep.subr.bf16.mxu0 %v653_v0  ;;  %503 = vmatprep.subr.bf16.mxu1 %v653_v0  ;;  %v562_v14 = vld [vmem:[#allocation6 + $0x58] sm:$0xff]   ;;  %v557_v15 = vld [vmem:[#allocation6 + $0x30] sm:$0xff]   ;;  %v563_v16 = vld [vmem:[#allocation6 + $0x60] sm:$0xff]  }
  0x2e   :  { %48 = vst.msk [vmem:[#allocation2] sm:$0xff] %vm47_vm1, %v46_v6  ;;  %v558_v17 = vld [vmem:[#allocation6 + $0x38] sm:$0xff]   ;;  %v564_v18 = vld [vmem:[#allocation6 + $0x68] sm:$0xff]   ;;  %v565_v20 = vld [vmem:[#allocation6 + $0x70] sm:$0xff]  }
  0x2f   :  { %50 = vst.msk [vmem:[#allocation2] sm:$0xff] %vm49_vm2, %v655_v10  ;;  %v566_v21 = vld [vmem:[#allocation6 + $0x78] sm:$0xff]   ;;  %v567_v22 = vld [vmem:[#allocation6 + $0x80] sm:$0xff]   ;;  %v568_v23 = vld [vmem:[#allocation6 + $0x88] sm:$0xff]  }
  0x30   :  { %484 = vmatpush3.bf16.msra.mxu0 %v552_v2  ;;  %504 = vmatpush3.bf16.msra.mxu1 %v560_v9  ;;  %v569_v24 = vld [vmem:[#allocation6 + $0x90] sm:$0xff]   ;;  %v570_v25 = vld [vmem:[#allocation6 + $0x98] sm:$0xff]   ;;  %v571_v26 = vld [vmem:[#allocation6 + $0xa0] sm:$0xff]  }
  0x31   :  { %485 = vmatprep.subr.bf16.mxu0 %v653_v0  ;;  %505 = vmatprep.subr.bf16.mxu1 %v653_v0  ;;  %v572_v27 = vld [vmem:[#allocation6 + $0xa8] sm:$0xff]   ;;  %v573_v38 = vld [vmem:[#allocation6 + $0xb0] sm:$0xff]   ;;  %v574_v39 = vld [vmem:[#allocation6 + $0xb8] sm:$0xff]  }
  0x32   :  { %v418_v28 = vld [vmem:[%s760_s2] ss:$0 sm:$0xff]  ;;  %v427_v40 = vld [vmem:[%s760_s2 + $0x1] ss:$0 sm:$0xff]  ;;  %v436_v50 = vld [vmem:[%s760_s2 + $0x2] ss:$0 sm:$0xff] }
  0x34   :  { %486 = vmatpush3.bf16.msra.mxu0 %v553_v3  ;;  %506 = vmatpush3.bf16.msra.mxu1 %v561_v12 }
  0x35   :  { %487 = vmatprep.subr.bf16.mxu0 %v653_v0  ;;  %507 = vmatprep.subr.bf16.mxu1 %v653_v0 }
  0x36   :  { %v51_v19 = vld [vmem:[#allocation2] sm:$0xff] }
  0x38   :  { %488 = vmatpush3.bf16.msra.mxu0 %v554_v8  ;;  %508 = vmatpush3.bf16.msra.mxu1 %v562_v14 }
  0x39   :  { %489 = vmatprep.subr.bf16.mxu0 %v653_v0  ;;  %509 = vmatprep.subr.bf16.mxu1 %v653_v0 }
  0x3c   :  { %490 = vmatpush3.bf16.msra.mxu0 %v555_v11  ;;  %510 = vmatpush3.bf16.msra.mxu1 %v563_v16 }
  0x3d   :  { %491 = vmatprep.subr.bf16.mxu0 %v653_v0  ;;  %511 = vmatprep.subr.bf16.mxu1 %v653_v0 }
  0x40   :  { %492 = vmatpush3.bf16.msra.mxu0 %v556_v13  ;;  %512 = vmatpush3.bf16.msra.mxu1 %v564_v18 }
  0x41   :  { %493 = vmatprep.subr.bf16.mxu0 %v653_v0  ;;  %513 = vmatprep.subr.bf16.mxu1 %v653_v0 }
  0x44   :  { %494 = vmatpush3.bf16.msra.mxu0 %v557_v15  ;;  %514 = vmatpush3.bf16.msra.mxu1 %v565_v20 }
  0x45   :  { %495 = vmatprep.subr.bf16.mxu0 %v653_v0  ;;  %515 = vmatprep.subr.bf16.mxu1 %v653_v0 }
  0x48   :  { %496 = vmatpush3.bf16.msra.mxu0 %v558_v17  ;;  %516 = vmatpush3.bf16.msra.mxu1 %v566_v21 }
  0x49   :  { %521 = vmatprep.subr.bf16.mxu0 %v653_v0 }
  0x4b   :  { %498 = vmatmul.mubr.bf16.vlgmr.msra.gmra.mrb[0].mxu0 %v51_v19 }
  0x4c   :  { %537 = vmatprep.mubr.msk.bf16.mxu0 %vm654_vm0, %v653_v0  ;;  %522 = vmatpush3.bf16.msra.mxu0 %v567_v22 }
  0x4d   :  { %523 = vmatprep.subr.bf16.mxu0 %v653_v0 }
  0x50   :  { %524 = vmatpush3.bf16.msra.mxu0 %v568_v23 }
  0x51   :  { %525 = vmatprep.subr.bf16.mxu0 %v653_v0 }
  0x54   :  { %526 = vmatpush3.bf16.msra.mxu0 %v569_v24 }
  0x55   :  { %527 = vmatprep.subr.bf16.mxu0 %v653_v0 }
  0x58   :  { %528 = vmatpush3.bf16.msra.mxu0 %v570_v25 }
  0x59   :  { %529 = vmatprep.subr.bf16.mxu0 %v653_v0 }
  0x5c   :  { %530 = vmatpush3.bf16.msra.mxu0 %v571_v26 }
  0x5d   :  { %531 = vmatprep.subr.bf16.mxu0 %v653_v0 }
  0x60   :  { %532 = vmatpush3.bf16.msra.mxu0 %v572_v27 }
  0x61   :  { %533 = vmatprep.subr.bf16.mxu0 %v653_v0 }
  0x64   :  { %534 = vmatpush3.bf16.msra.mxu0 %v573_v38 }
  0x65   :  { %535 = vmatprep.subr.bf16.mxu0 %v653_v0 }
  0x68   :  { %536 = vmatpush3.bf16.msra.mxu0 %v574_v39 }
 0x11e   :  { %v191_v29 = vpop.f32.mrb[0].mxu0 }
 0x11f   :  { %v192_v30 = vadd.f32 %v418_v28, %v191_v29  ;;  %v499_v31 = vpop.f32.mrb[1].mxu0 }
 0x120   :  { %v194_v32 = vpop.f32.mrb[2].mxu0 }
 0x121   :  { %v195_v33 = vadd.f32 %v418_v28, %v194_v32  ;;  %v500_v34 = vpop.f32.mrb[3].mxu0  ;;  %v198_v35 = vmax.f32 %v192_v30, 0.0 }
 0x123   :  { %v199_v36 = vmax.f32 %v195_v33, 0.0 }
 0x125   :  { %v200_v37 = vpack.c.bf16 %v199_v36, %v198_v35 }
 0x127   :  { %518 = vmatmul.mubr.bf16.vlgmr.msra.gmra.mrb[0].mxu1 %v200_v37 }
 0x1fa   :  { %v287_v41 = vpop.f32.mrb[0].mxu1 }
 0x1fb   :  { %v288_v42 = vadd.f32 %v427_v40, %v287_v41  ;;  %v519_v43 = vpop.f32.mrb[1].mxu1 }
 0x1fc   :  { %v290_v44 = vpop.f32.mrb[2].mxu1 }
 0x1fd   :  { %v291_v45 = vadd.f32 %v427_v40, %v290_v44  ;;  %v520_v46 = vpop.f32.mrb[3].mxu1  ;;  %v294_v47 = vmax.f32 %v288_v42, 0.0 }
 0x1ff   :  { %v295_v48 = vmax.f32 %v291_v45, 0.0 }
 0x201   :  { %v296_v49 = vpack.c.bf16 %v295_v48, %v294_v47 }
 0x203   :  { %538 = vmatmul.mubr.bf16.vlgmr.msra.gmra.mrb[4].mxu0 %v296_v49 }
 0x2d6   :  { %v383_v51 = vpop.f32.mrb[4].mxu0 }
 0x2d7   :  { %v539_v52 = vpop.f32.mrb[5].mxu0  ;;  %v384_v54 = vadd.f32 %v436_v50, %v383_v51 }
 0x2d8   :  { %v386_v53 = vpop.f32.mrb[6].mxu0 }
 0x2d9   :  { %v387_v55 = vadd.f32 %v436_v50, %v386_v53  ;;  %v540_v56 = vpop.f32.mrb[7].mxu0 }
 0x2db   :  { %v452_v57 = vpack.c.bf16 %v387_v55, %v384_v54 }
 0x2dd   :  { %453 = vst [vmem:[#allocation8] sm:$0xff] %v452_v57  }
 0x2de   :  { %404 = vsyncadd [#allocation5], 64  ;;  %s656_s18 = smov [#allocation8]  }
 0x2df   :  { %s405_s19 = sshll.u32 %s656_s18, 4  ;;  %s406_s19 = int_to_ptr.vmem [resolvable:$true] %s405_s19 }
 0x2e0   :  { %s619_s20 = scalar_lea.vmem %s406_s19, 64  ;;  %s623_s21 = scalar_lea.vmem %s406_s19, 128 }
 0x2e1   :  { %p620_p2 = scmp.ne.s32.totalorder %s406_s19, %s619_s20  ;;  %p624_p3 = scmp.lt.s32.totalorder %s406_s19, %s406_s19 }
 0x2e2   :  { %p625_p4 = scmp.lt.s32.totalorder %s623_s21, %s619_s20 }
 0x2e4   :  { %p626_p5 = por %p625_p4, %p624_p3 }
 0x2e6   :  { %p627_p6 = pnand %p626_p5, %p620_p2 }
 0x2e8   :  { %630 = shalt.err (!%p627_p6)
}
 0x2e9   :  { %s631_s23 = scalar_lea.hbm %s761_s3, 64 }
 0x2ea   :  { %p632_p7 = scmp.ne.s32.totalorder %s761_s3, %s631_s23  ;;  %p635_p8 = scmp.lt.u32.totalorder %s631_s23, %s761_s3 }
 0x2ec   :  { %p637_p9 = pnand %p635_p8, %p632_p7 }
 0x2ee   :  { %640 = shalt.err (!%p637_p9)
}
 0x2ef   :  { %411 = dma.vmem_to_hbm [thread:$0]  %s406_s19, 64, %s761_s3, [#allocation5], %s651_s0, %s651_s0, %s652_s10  }
 0x2f0   :  { %645 = dma.done.wait [#allocation5], 128  }
 0x2f1   :  { %646 = vsyncadd [#allocation5], 4294967168 }
 0x2f2   :  { %415 = vsyncpa [#allocation4], 1 }
 0x2f3   :  { %416 = vsyncpa [#allocation7], 1 }
 0x2f4   :  { %417 = vsyncpa [#allocation5], 1 }

// kernel: tpu_custom_call.1
= control target key start
LH: loop header
LB: loop body
LE: loop exit
PB: predicated region body
PF: predicated region fallthrough
CT: control target
= control target key end

     0   :  { %8 = vsyncpa [#allocation4], 0  ;;  %s758_s0 = inlined_call_operand.hbm [shape: f32[8,16], index: 0, kind: input, shape index: {}]   ;;  %s759_s1 = inlined_call_operand.hbm [shape: bf16[3,128,128], index: 1, kind: input, shape index: {}]   ;;  %s760_s2 = inlined_call_operand.vmem [shape: f32[3,128], index: 2, kind: input, shape index: {}]   ;;  %s761_s3 = inlined_call_operand.hbm [shape: bf16[8,128], index: 3, kind: output, shape index: {}]  }
   0x1   :  { %9 = vsyncpa [#allocation7], 0 }
   0x2   :  { %10 = vsyncpa [#allocation5], 0 }
   0x3   :  { %15 = vsyncadd [#allocation4], 128  ;;  %s647_s12 = smov [#allocation3]   ;;  %s575_s16 = scalar_lea.hbm %s758_s0, 128 }
   0x4   :  { %s16_s13 = sshll.u32 %s647_s12, 4  ;;  %p576_p0 = scmp.ne.s32.totalorder %s758_s0, %s575_s16  ;;  %s17_s13 = int_to_ptr.vmem [resolvable:$true] %s16_s13 }
   0x5   :  { %p579_p1 = scmp.lt.u32.totalorder %s575_s16, %s758_s0 }
   0x7   :  { %p581_p2 = pnand %p579_p1, %p576_p0 }
   0x9   :  { %584 = shalt.err (!%p581_p2)
}
   0xa   :  { %s585_s21 = scalar_lea.vmem %s17_s13, 128  ;;  %s589_s22 = scalar_lea.vmem %s17_s13, 256 }
   0xb   :  { %p586_p3 = scmp.ne.s32.totalorder %s17_s13, %s585_s21  ;;  %p590_p4 = scmp.lt.s32.totalorder %s17_s13, %s17_s13 }
   0xc   :  { %p591_p5 = scmp.lt.s32.totalorder %s589_s22, %s585_s21 }
   0xe   :  { %p592_p6 = por %p591_p5, %p590_p4 }
  0x10   :  { %p593_p7 = pnand %p592_p6, %p586_p3 }
  0x12   :  { %596 = shalt.err (!%p593_p7)
}
  0x13   :  { %s648_s23 = smov 128   ;;  %s649_s24 = smov 8  }
  0x14   :  { %22 = dma.hbm_to_vmem [thread:$0]  %s758_s0, 128, %s17_s13, [#allocation4], %s648_s23, %s648_s23, %s649_s24  }
  0x15   :  { %s650_s27 = smov [#allocation6]   ;;  %s597_s4 = scalar_lea.hbm %s759_s1, 3072 }
  0x16   :  { %s28_s28 = sshll.u32 %s650_s27, 4  ;;  %p598_p8 = scmp.ne.s32.totalorder %s759_s1, %s597_s4  ;;  %s29_s28 = int_to_ptr.vmem [resolvable:$true] %s28_s28 }
  0x17   :  { %p601_p9 = scmp.lt.u32.totalorder %s597_s4, %s759_s1 }
  0x19   :  { %p603_p10 = pnand %p601_p9, %p598_p8 }
  0x1b   :  { %606 = shalt.err (!%p603_p10)
}
  0x1c   :  { %s607_s9 = scalar_lea.vmem %s29_s28, 3072  ;;  %p612_p12 = scmp.lt.s32.totalorder %s29_s28, %s29_s28 }
  0x1d   :  { %p608_p11 = scmp.ne.s32.totalorder %s29_s28, %s607_s9  ;;  %p613_p13 = scmp.lt.s32.totalorder %s607_s9, %s607_s9 }
  0x1f   :  { %p614_p0 = por %p613_p13, %p612_p12 }
  0x21   :  { %p615_p1 = pnand %p614_p0, %p608_p11 }
  0x23   :  { %618 = shalt.err (!%p615_p1)
}
  0x24   :  { %s651_s0 = smov 64   ;;  %s652_s10 = smov 4  }
  0x25   :  { %34 = dma.hbm_to_vmem [thread:$0]  %s759_s1, 3072, %s29_s28, [#allocation7], %s651_s0, %s651_s0, %s652_s10  }
  0x26   :  { %641 = dma.done.wait [#allocation4], 256  }
  0x27   :  { %642 = vsyncadd [#allocation4], 4294967040 }
  0x28   :  { %643 = dma.done.wait [#allocation7], 3072  }
  0x29   :  { %644 = vsyncadd [#allocation7], 4294964224  ;;  %v653_v0 = vmov 0.0   ;;  %vm654_vm0 = vmmov 0   ;;  %v551_v1 = vld [vmem:[#allocation6] sm:$0xff]   ;;  %v552_v2 = vld [vmem:[#allocation6 + $0x8] sm:$0xff]  }
  0x2a   :  { %481 = vmatprep.subr.bf16.mxu0 %v653_v0  ;;  %497 = vmatprep.mubr.msk.bf16.mxu0 %vm654_vm0, %v653_v0  ;;  %v553_v3 = vld [vmem:[#allocation6 + $0x10] sm:$0xff]   ;;  %v45_v5 = vld [vmem:[#allocation3 + $0x8] sm:$0xff]  ;;  %vm47_vm1 = vcmask 130048   ;;  %vm49_vm2 = vcmask 1047680   ;;  %v559_v7 = vld [vmem:[#allocation6 + $0x40] sm:$0xff]   ;;  %v655_v10 = vmov 0  }
  0x2b   :  { %501 = vmatprep.subr.bf16.mxu1 %v653_v0  ;;  %517 = vmatprep.mubr.msk.bf16.mxu1 %vm654_vm0, %v653_v0  ;;  %v44_v4 = vld [vmem:[#allocation3] sm:$0xff]  ;;  %v554_v8 = vld [vmem:[#allocation6 + $0x18] sm:$0xff]   ;;  %v560_v9 = vld [vmem:[#allocation6 + $0x48] sm:$0xff]  }
  0x2c   :  { %482 = vmatpush3.bf16.msra.mxu0 %v551_v1  ;;  %v46_v6 = vpack.c.bf16 %v45_v5, %v44_v4  ;;  %502 = vmatpush3.bf16.msra.mxu1 %v559_v7  ;;  %v555_v11 = vld [vmem:[#allocation6 + $0x20] sm:$0xff]   ;;  %v561_v12 = vld [vmem:[#allocation6 + $0x50] sm:$0xff]   ;;  %v556_v13 = vld [vmem:[#allocation6 + $0x28] sm:$0xff]  }
  0x2d   :  { %483 = vmatprep.subr.bf16.mxu0 %v653_v0  ;;  %503 = vmatprep.subr.bf16.mxu1 %v653_v0  ;;  %v562_v14 = vld [vmem:[#allocation6 + $0x58] sm:$0xff]   ;;  %v557_v15 = vld [vmem:[#allocation6 + $0x30] sm:$0xff]   ;;  %v563_v16 = vld [vmem:[#allocation6 + $0x60] sm:$0xff]  }
  0x2e   :  { %48 = vst.msk [vmem:[#allocation2] sm:$0xff] %vm47_vm1, %v46_v6  ;;  %v558_v17 = vld [vmem:[#allocation6 + $0x38] sm:$0xff]   ;;  %v564_v18 = vld [vmem:[#allocation6 + $0x68] sm:$0xff]   ;;  %v565_v20 = vld [vmem:[#allocation6 + $0x70] sm:$0xff]  }
  0x2f   :  { %50 = vst.msk [vmem:[#allocation2] sm:$0xff] %vm49_vm2, %v655_v10  ;;  %v566_v21 = vld [vmem:[#allocation6 + $0x78] sm:$0xff]   ;;  %v567_v22 = vld [vmem:[#allocation6 + $0x80] sm:$0xff]   ;;  %v568_v23 = vld [vmem:[#allocation6 + $0x88] sm:$0xff]  }
  0x30   :  { %484 = vmatpush3.bf16.msra.mxu0 %v552_v2  ;;  %504 = vmatpush3.bf16.msra.mxu1 %v560_v9  ;;  %v569_v24 = vld [vmem:[#allocation6 + $0x90] sm:$0xff]   ;;  %v570_v25 = vld [vmem:[#allocation6 + $0x98] sm:$0xff]   ;;  %v571_v26 = vld [vmem:[#allocation6 + $0xa0] sm:$0xff]  }
  0x31   :  { %485 = vmatprep.subr.bf16.mxu0 %v653_v0  ;;  %505 = vmatprep.subr.bf16.mxu1 %v653_v0  ;;  %v572_v27 = vld [vmem:[#allocation6 + $0xa8] sm:$0xff]   ;;  %v573_v38 = vld [vmem:[#allocation6 + $0xb0] sm:$0xff]   ;;  %v574_v39 = vld [vmem:[#allocation6 + $0xb8] sm:$0xff]  }
  0x32   :  { %v418_v28 = vld [vmem:[%s760_s2] ss:$0 sm:$0xff]  ;;  %v427_v40 = vld [vmem:[%s760_s2 + $0x1] ss:$0 sm:$0xff]  ;;  %v436_v50 = vld [vmem:[%s760_s2 + $0x2] ss:$0 sm:$0xff] }
  0x34   :  { %486 = vmatpush3.bf16.msra.mxu0 %v553_v3  ;;  %506 = vmatpush3.bf16.msra.mxu1 %v561_v12 }
  0x35   :  { %487 = vmatprep.subr.bf16.mxu0 %v653_v0  ;;  %507 = vmatprep.subr.bf16.mxu1 %v653_v0 }
  0x36   :  { %v51_v19 = vld [vmem:[#allocation2] sm:$0xff] }
  0x38   :  { %488 = vmatpush3.bf16.msra.mxu0 %v554_v8  ;;  %508 = vmatpush3.bf16.msra.mxu1 %v562_v14 }
  0x39   :  { %489 = vmatprep.subr.bf16.mxu0 %v653_v0  ;;  %509 = vmatprep.subr.bf16.mxu1 %v653_v0 }
  0x3c   :  { %490 = vmatpush3.bf16.msra.mxu0 %v555_v11  ;;  %510 = vmatpush3.bf16.msra.mxu1 %v563_v16 }
  0x3d   :  { %491 = vmatprep.subr.bf16.mxu0 %v653_v0  ;;  %511 = vmatprep.subr.bf16.mxu1 %v653_v0 }
  0x40   :  { %492 = vmatpush3.bf16.msra.mxu0 %v556_v13  ;;  %512 = vmatpush3.bf16.msra.mxu1 %v564_v18 }
  0x41   :  { %493 = vmatprep.subr.bf16.mxu0 %v653_v0  ;;  %513 = vmatprep.subr.bf16.mxu1 %v653_v0 }
  0x44   :  { %494 = vmatpush3.bf16.msra.mxu0 %v557_v15  ;;  %514 = vmatpush3.bf16.msra.mxu1 %v565_v20 }
  0x45   :  { %495 = vmatprep.subr.bf16.mxu0 %v653_v0  ;;  %515 = vmatprep.subr.bf16.mxu1 %v653_v0 }
  0x48   :  { %496 = vmatpush3.bf16.msra.mxu0 %v558_v17  ;;  %516 = vmatpush3.bf16.msra.mxu1 %v566_v21 }
  0x49   :  { %521 = vmatprep.subr.bf16.mxu0 %v653_v0 }
  0x4b   :  { %498 = vmatmul.mubr.bf16.vlgmr.msra.gmra.mrb[0].mxu0 %v51_v19 }
  0x4c   :  { %537 = vmatprep.mubr.msk.bf16.mxu0 %vm654_vm0, %v653_v0  ;;  %522 = vmatpush3.bf16.msra.mxu0 %v567_v22 }
  0x4d   :  { %523 = vmatprep.subr.bf16.mxu0 %v653_v0 }
  0x50   :  { %524 = vmatpush3.bf16.msra.mxu0 %v568_v23 }
  0x51   :  { %525 = vmatprep.subr.bf16.mxu0 %v653_v0 }
  0x54   :  { %526 = vmatpush3.bf16.msra.mxu0 %v569_v24 }
  0x55   :  { %527 = vmatprep.subr.bf16.mxu0 %v653_v0 }
  0x58   :  { %528 = vmatpush3.bf16.msra.mxu0 %v570_v25 }
  0x59   :  { %529 = vmatprep.subr.bf16.mxu0 %v653_v0 }
  0x5c   :  { %530 = vmatpush3.bf16.msra.mxu0 %v571_v26 }
  0x5d   :  { %531 = vmatprep.subr.bf16.mxu0 %v653_v0 }
  0x60   :  { %532 = vmatpush3.bf16.msra.mxu0 %v572_v27 }
  0x61   :  { %533 = vmatprep.subr.bf16.mxu0 %v653_v0 }
  0x64   :  { %534 = vmatpush3.bf16.msra.mxu0 %v573_v38 }
  0x65   :  { %535 = vmatprep.subr.bf16.mxu0 %v653_v0 }
  0x68   :  { %536 = vmatpush3.bf16.msra.mxu0 %v574_v39 }
 0x11e   :  { %v191_v29 = vpop.f32.mrb[0].mxu0 }
 0x11f   :  { %v192_v30 = vadd.f32 %v418_v28, %v191_v29  ;;  %v499_v31 = vpop.f32.mrb[1].mxu0 }
 0x120   :  { %v194_v32 = vpop.f32.mrb[2].mxu0 }
 0x121   :  { %v195_v33 = vadd.f32 %v418_v28, %v194_v32  ;;  %v500_v34 = vpop.f32.mrb[3].mxu0  ;;  %v198_v35 = vmax.f32 %v192_v30, 0.0 }
 0x123   :  { %v199_v36 = vmax.f32 %v195_v33, 0.0 }
 0x125   :  { %v200_v37 = vpack.c.bf16 %v199_v36, %v198_v35 }
 0x127   :  { %518 = vmatmul.mubr.bf16.vlgmr.msra.gmra.mrb[0].mxu1 %v200_v37 }
 0x1fa   :  { %v287_v41 = vpop.f32.mrb[0].mxu1 }
 0x1fb   :  { %v288_v42 = vadd.f32 %v427_v40, %v287_v41  ;;  %v519_v43 = vpop.f32.mrb[1].mxu1 }
 0x1fc   :  { %v290_v44 = vpop.f32.mrb[2].mxu1 }
 0x1fd   :  { %v291_v45 = vadd.f32 %v427_v40, %v290_v44  ;;  %v520_v46 = vpop.f32.mrb[3].mxu1  ;;  %v294_v47 = vmax.f32 %v288_v42, 0.0 }
 0x1ff   :  { %v295_v48 = vmax.f32 %v291_v45, 0.0 }
 0x201   :  { %v296_v49 = vpack.c.bf16 %v295_v48, %v294_v47 }
 0x203   :  { %538 = vmatmul.mubr.bf16.vlgmr.msra.gmra.mrb[4].mxu0 %v296_v49 }
 0x2d6   :  { %v383_v51 = vpop.f32.mrb[4].mxu0 }
 0x2d7   :  { %v539_v52 = vpop.f32.mrb[5].mxu0  ;;  %v384_v54 = vadd.f32 %v436_v50, %v383_v51 }
 0x2d8   :  { %v386_v53 = vpop.f32.mrb[6].mxu0 }
 0x2d9   :  { %v387_v55 = vadd.f32 %v436_v50, %v386_v53  ;;  %v540_v56 = vpop.f32.mrb[7].mxu0 }
 0x2db   :  { %v452_v57 = vpack.c.bf16 %v387_v55, %v384_v54 }
 0x2dd   :  { %453 = vst [vmem:[#allocation8] sm:$0xff] %v452_v57  }
 0x2de   :  { %404 = vsyncadd [#allocation5], 64  ;;  %s656_s18 = smov [#allocation8]  }
 0x2df   :  { %s405_s19 = sshll.u32 %s656_s18, 4  ;;  %s406_s19 = int_to_ptr.vmem [resolvable:$true] %s405_s19 }
 0x2e0   :  { %s619_s20 = scalar_lea.vmem %s406_s19, 64  ;;  %s623_s21 = scalar_lea.vmem %s406_s19, 128 }
 0x2e1   :  { %p620_p2 = scmp.ne.s32.totalorder %s406_s19, %s619_s20  ;;  %p624_p3 = scmp.lt.s32.totalorder %s406_s19, %s406_s19 }
 0x2e2   :  { %p625_p4 = scmp.lt.s32.totalorder %s623_s21, %s619_s20 }
 0x2e4   :  { %p626_p5 = por %p625_p4, %p624_p3 }
 0x2e6   :  { %p627_p6 = pnand %p626_p5, %p620_p2 }
 0x2e8   :  { %630 = shalt.err (!%p627_p6)
}
 0x2e9   :  { %s631_s23 = scalar_lea.hbm %s761_s3, 64 }
 0x2ea   :  { %p632_p7 = scmp.ne.s32.totalorder %s761_s3, %s631_s23  ;;  %p635_p8 = scmp.lt.u32.totalorder %s631_s23, %s761_s3 }
 0x2ec   :  { %p637_p9 = pnand %p635_p8, %p632_p7 }
 0x2ee   :  { %640 = shalt.err (!%p637_p9)
}
 0x2ef   :  { %411 = dma.vmem_to_hbm [thread:$0]  %s406_s19, 64, %s761_s3, [#allocation5], %s651_s0, %s651_s0, %s652_s10  }
 0x2f0   :  { %645 = dma.done.wait [#allocation5], 128  }
 0x2f1   :  { %646 = vsyncadd [#allocation5], 4294967168 }
 0x2f2   :  { %415 = vsyncpa [#allocation4], 1 }
 0x2f3   :  { %416 = vsyncpa [#allocation7], 1 }
 0x2f4   :  { %417 = vsyncpa [#allocation5], 1 }

</bundles_post_ra>
